<compile_context>
chip_gen: v7x
topology: tpu7x:2x2x1
jax: 0.10.0
libtpu: 0.0.40
codegen_flags: <defaults>
</compile_context>

<pallas_src>
from functools import partial

import jax
import jax.numpy as jnp
from jax.experimental import pallas as pl
from jax.experimental.pallas import tpu as pltpu


def _affine_kernel(x_ref, o_ref, *, scale, bias):
    # Single fused affine transform on the whole VMEM tile (VPU work).
    # scale/bias are Python floats (weakly typed) so the math stays in the
    # input dtype (f32 or bf16) -- no upcast, no extra HBM traffic.
    o_ref[...] = x_ref[...] * scale + bias


def _choose_width(n, candidates=(4096, 2048, 1024, 512, 256, 128)):
    """Pick a lane width W (multiple of 128) that divides n.

    Prefer a W that also leaves a sublane-dense row count (rows % 8 == 0);
    otherwise take the largest W that divides n. Returns None if even 128
    does not divide n (caller falls back to a small tail pad).
    """
    best = None
    for w in candidates:
        if n % w == 0:
            rows = n // w
            if rows % 8 == 0:
                return w
            if best is None:
                best = w
    return best


def normalize_layer(x, min_val: float, max_val: float):
    """(x - min)/(max - min) * 2 - 1, elementwise, via one Pallas kernel.

    x: any-shaped floating-point array (e.g. NCHW). Returns same shape/dtype.
    """
    if float(max_val) == float(min_val):
        raise ValueError("NormalizeLayer requires max_val != min_val")
    if not jnp.issubdtype(x.dtype, jnp.floating):
        raise TypeError("normalize_layer expects a floating-point input")

    orig_shape = x.shape
    orig_dtype = x.dtype
    n = x.size
    itemsize = jnp.dtype(orig_dtype).itemsize

    # Fold the two-step normalize into one affine transform (trace-time consts).
    inv_range = 1.0 / (float(max_val) - float(min_val))
    scale = 2.0 * inv_range
    bias = -2.0 * float(min_val) * inv_range - 1.0

    # Flatten to a lane-dense 2D slab (rows, W), W a multiple of 128.
    w = _choose_width(n)
    x_flat = jnp.reshape(x, (-1,))
    pad = 0
    if w is None:
        # Fallback only when n is not a multiple of 128: pad the tail up to
        # one (8,128) row-group and slice it off afterwards. Padded garbage
        # is harmless for an elementwise op.
        w = 128
        rows = pl.cdiv(n, w)
        rows = pl.cdiv(rows, 8) * 8
        pad = rows * w - n
        x_flat = jnp.pad(x_flat, (0, pad))
    rows = x_flat.size // w
    x2d = jnp.reshape(x_flat, (rows, w))

    # Block rows: target ~2 MiB per block (input + output, each double-
    # buffered => ~8 MiB VMEM, safe on every generation's default limit).
    target_rows = max(1, (2 * 1024 * 1024) // (w * itemsize))
    if rows <= target_rows:
        row_tile = rows                      # single full-array block, grid = 1
    else:
        row_tile = max(8, (target_rows // 8) * 8)   # sublane-aligned tile
    grid = (pl.cdiv(rows, row_tile),)

    kernel = partial(_affine_kernel, scale=scale, bias=bias)

    out2d = pl.pallas_call(
        kernel,
        out_shape=jax.ShapeDtypeStruct((rows, w), orig_dtype),
        grid=grid,
        in_specs=[pl.BlockSpec((row_tile, w), lambda i: (i, 0))],
        out_specs=pl.BlockSpec((row_tile, w), lambda i: (i, 0)),
        compiler_params=pltpu.CompilerParams(
            dimension_semantics=("parallel",)),   # lets v7x split across 2 TCs
    )(x2d)

    out_flat = jnp.reshape(out2d, (-1,))
    if pad:
        out_flat = out_flat[:n]
    return jnp.reshape(out_flat, orig_shape)


if __name__ == "__main__":
    # Module "parameters" (from __init__): min_val, max_val — deterministic.
    min_val = -3.0
    max_val = 5.0

    key = jax.random.PRNGKey(0)
    # NCHW input, small shapes: batch=2, channels=4, spatial=16x16.
    x = jax.random.uniform(key, (2, 4, 16, 16), dtype=jnp.float32,
                           minval=min_val, maxval=max_val)

    out = normalize_layer(x, min_val, max_val)
    out = jax.block_until_ready(out)

    # Reference check (plain JAX), same semantics as the PyTorch module.
    ref = ((x - min_val) / (max_val - min_val)) * 2.0 - 1.0
    assert out.shape == x.shape and out.dtype == x.dtype
    assert jnp.allclose(out, ref, atol=1e-5, rtol=1e-5), "mismatch vs reference"

    print("KERNEL_OK")
</pallas_src>

<mosaic_0001>
module attributes {stable_mosaic.version = 11 : i64} {
  func.func @_affine_kernel(%arg0: i32, %arg1: memref<8x256xf32, #tpu.memory_space<vmem>>, %arg2: memref<8x256xf32, #tpu.memory_space<vmem>>) attributes {dimension_semantics = [#tpu.dimension_semantics<parallel>], iteration_bounds = array<i64: 1>, scalar_prefetch = 0 : i64, scratch_operands = 0 : i64, tpu.core_type = #tpu.core_type<tc>, window_params = [{transform_indices = @transform_0, window_bounds = array<i64: 8, 256>}, {transform_indices = @transform_1, window_bounds = array<i64: 8, 256>}]} {
    %c0 = arith.constant 0 : index
    %c0_0 = arith.constant 0 : index
    %0 = vector.load %arg1[%c0, %c0_0] : memref<8x256xf32, #tpu.memory_space<vmem>>, vector<8x256xf32>
    %cst = arith.constant 2.500000e-01 : f32
    %1 = vector.broadcast %cst : f32 to vector<8x256xf32>
    %2 = arith.mulf %0, %1 : vector<8x256xf32>
    %cst_1 = arith.constant -2.500000e-01 : f32
    %3 = vector.broadcast %cst_1 : f32 to vector<8x256xf32>
    %4 = arith.addf %2, %3 : vector<8x256xf32>
    %c0_2 = arith.constant 0 : index
    %c0_3 = arith.constant 0 : index
    %5 = vector.load %arg2[%c0_2, %c0_3] : memref<8x256xf32, #tpu.memory_space<vmem>>, vector<8x256xf32>
    tpu.vector_store %arg2[%c0_2, %c0_3], %4 {strides = array<i32>} : memref<8x256xf32, #tpu.memory_space<vmem>>, vector<8x256xf32>,
    return
  }
  func.func @transform_0(%arg0: i32) -> (i32, i32) {
    %c0_i32 = arith.constant 0 : i32
    %c0_i32_0 = arith.constant 0 : i32
    return %arg0, %c0_i32 : i32, i32
  }
  func.func @transform_1(%arg0: i32) -> (i32, i32) {
    %c0_i32 = arith.constant 0 : i32
    %c0_i32_0 = arith.constant 0 : i32
    return %arg0, %c0_i32 : i32, i32
  }
}

</mosaic_0001>

<bundles_post_ra>
// kernel: tpu_custom_call.1
= control target key start
LH: loop header
LB: loop body
LE: loop exit
PB: predicated region body
PF: predicated region fallthrough
CT: control target
= control target key end

     0   :  { %6 = vsyncpa [#allocation3], 0  ;;  %s130_s0 = inlined_call_operand.hbm [shape: f32[8,256], index: 0, kind: input, shape index: {}]   ;;  %s131_s1 = inlined_call_operand.hbm [shape: f32[8,256], index: 1, kind: output, shape index: {}]  }
   0x1   :  { %7 = vsyncpa [#allocation4], 0  ;;  %s94_s6 = smov [#allocation2]   ;;  %s46_s10 = scalar_lea.hbm %s130_s0, 256 }
   0x2   :  { %s14_s7 = sshll.u32 %s94_s6, 4  ;;  %p47_p0 = scmp.ne.s32.totalorder %s130_s0, %s46_s10  ;;  %s15_s7 = int_to_ptr.vmem [resolvable:$true] %s14_s7 }
   0x3   :  { %p50_p1 = scmp.lt.u32.totalorder %s46_s10, %s130_s0 }
   0x5   :  { %p52_p2 = pnand %p50_p1, %p47_p0 }
   0x7   :  { %55 = shalt.err (!%p52_p2)
}
   0x8   :  { %s56_s15 = scalar_lea.vmem %s15_s7, 256  ;;  %p61_p4 = scmp.lt.s32.totalorder %s15_s7, %s15_s7 }
   0x9   :  { %p57_p3 = scmp.ne.s32.totalorder %s15_s7, %s56_s15  ;;  %p62_p5 = scmp.lt.s32.totalorder %s56_s15, %s56_s15 }
   0xb   :  { %p63_p6 = por %p62_p5, %p61_p4 }
   0xd   :  { %p64_p7 = pnand %p63_p6, %p57_p3 }
   0xf   :  { %67 = shalt.err (!%p64_p7)
}
  0x10   :  { %17 = dma.hbm_to_vmem [thread:$0]  %s130_s0, 256, %s15_s7, [#allocation3]  }
  0x11   :  { %90 = dma.done.wait [#allocation3], 256  }
  0x12   :  { %91 = vsyncadd [#allocation3], 4294967040  ;;  %v21_v0 = vld [vmem:[#allocation2] sm:$0xff]  ;;  %v22_v1 = vld [vmem:[#allocation2 + $0x8] sm:$0xff]  ;;  %s95_s18 = smov [#allocation5]  }
  0x13   :  { %s35_s19 = sshll.u32 %s95_s18, 4  ;;  %v23_v2 = vmul.f32 0.25, %v21_v0  ;;  %v24_v3 = vmul.f32 0.25, %v22_v1  ;;  %s36_s19 = int_to_ptr.vmem [resolvable:$true] %s35_s19 }
  0x14   :  { %s68_s20 = scalar_lea.vmem %s36_s19, 256  ;;  %p73_p9 = scmp.lt.s32.totalorder %s36_s19, %s36_s19 }
  0x15   :  { %v25_v4 = vadd.f32 -0.25, %v23_v2  ;;  %v26_v5 = vadd.f32 -0.25, %v24_v3  ;;  %p69_p8 = scmp.ne.s32.totalorder %s36_s19, %s68_s20  ;;  %p74_p10 = scmp.lt.s32.totalorder %s68_s20, %s68_s20 }
  0x17   :  { %27 = vst [vmem:[#allocation5] sm:$0xff] %v25_v4  ;;  %28 = vst [vmem:[#allocation5 + $0x8] sm:$0xff] %v26_v5  ;;  %p75_p11 = por %p74_p10, %p73_p9 }
  0x19   :  { %p76_p12 = pnand %p75_p11, %p69_p8 }
  0x1b   :  { %79 = shalt.err (!%p76_p12)
}
  0x1c   :  { %s80_s22 = scalar_lea.hbm %s131_s1, 256 }
  0x1d   :  { %p81_p13 = scmp.ne.s32.totalorder %s131_s1, %s80_s22  ;;  %p84_p0 = scmp.lt.u32.totalorder %s80_s22, %s131_s1 }
  0x1f   :  { %p86_p1 = pnand %p84_p0, %p81_p13 }
  0x21   :  { %89 = shalt.err (!%p86_p1)
}
  0x22   :  { %38 = dma.vmem_to_hbm [thread:$0]  %s36_s19, 256, %s131_s1, [#allocation4]  }
  0x23   :  { %92 = dma.done.wait [#allocation4], 256  }
  0x24   :  { %93 = vsyncadd [#allocation4], 4294967040 }
  0x25   :  { %42 = vsyncpa [#allocation3], 1 }
  0x26   :  { %43 = vsyncpa [#allocation4], 1 }

</bundles_post_ra>
